<compile_context>
chip_gen: v5e
topology: v5e:2x2
jax: 0.10.0
libtpu: 0.0.40
codegen_flags: <defaults>
</compile_context>

<pallas_src>
import jax
import jax.numpy as jnp
import numpy as np
from jax import lax
from jax.experimental import pallas as pl
from jax.experimental.pallas import tpu as pltpu


# --------------------------------------------------------------------------- #
# Kernels
# --------------------------------------------------------------------------- #
def _make_attention_kernel(c_real, c_pad):
    """energy = sum_t X_t @ X_t^T ; then attention = softmax(rowmax - energy)."""
    need_mask = c_pad != c_real

    def kernel(x_ref, attn_ref, acc_ref):
        t = pl.program_id(1)

        @pl.when(t == 0)
        def _():
            acc_ref[...] = jnp.zeros_like(acc_ref)

        xt = x_ref[0]  # [C_pad, tile_hw], lane-dense
        # energy[c, d] += sum_n x[c, n] * x[d, n]  (contract on the lane axis)
        acc_ref[...] += lax.dot_general(
            xt, xt,
            dimension_numbers=(((1,), (1,)), ((), ())),
            preferred_element_type=jnp.float32)

        @pl.when(t == pl.num_programs(1) - 1)
        def _():
            energy = acc_ref[...]                                    # [C_pad, C_pad]
            if need_mask:
                col_ok = lax.broadcasted_iota(jnp.int32, energy.shape, 1) < c_real
                masked = lambda e: jnp.where(col_ok, e, jnp.float32(-1e30))
            else:
                masked = lambda e: e
            row_max = jnp.max(masked(energy), axis=-1, keepdims=True)
            e_new = masked(row_max - energy)
            e_new = e_new - jnp.max(e_new, axis=-1, keepdims=True)   # stable softmax
            p = jnp.exp(e_new)
            attn = p / jnp.sum(p, axis=-1, keepdims=True)
            attn_ref[0] = attn.astype(attn_ref.dtype)

    return kernel


def _apply_kernel(gamma_ref, attn_ref, x_ref, o_ref):
    """out_tile = gamma * (attention @ x_tile) + x_tile (lane-dense H*W tiles)."""
    g = gamma_ref[0]                 # scalar from SMEM
    attn = attn_ref[0]               # [C_pad, C_pad], VMEM-resident across tiles
    xt = x_ref[0]                    # [C_pad, tile_hw]
    out = jnp.dot(attn, xt, preferred_element_type=jnp.float32)
    o_ref[0] = (g * out + xt.astype(jnp.float32)).astype(o_ref.dtype)


# --------------------------------------------------------------------------- #
# Wrapper
# --------------------------------------------------------------------------- #
def _pick_hw_tile(hw_pad, c_pad, vmem_budget_bytes=8 * 1024 * 1024):
    """Largest multiple-of-128 tile along H*W that divides hw_pad within budget."""
    bytes_per_col = c_pad * 4 * 4          # x tile (2 bufs) + out tile (2 bufs), f32
    max_tile = max(128, vmem_budget_bytes // bytes_per_col)
    max_tile = min(hw_pad, (max_tile // 128) * 128)
    t = max_tile
    while t >= 128:
        if hw_pad % t == 0:
            return t
        t -= 128
    return hw_pad


@jax.jit
def cam_module(x_nchw, gamma):
    B, C, H, W = x_nchw.shape
    HW = H * W
    x = x_nchw.reshape(B, C, HW)                     # pure reshape (no transpose)

    C_pad = C if C % 8 == 0 else (C + 7) // 8 * 8
    HW_pad = HW if HW % 128 == 0 else (HW + 127) // 128 * 128
    if C_pad != C or HW_pad != HW:
        x_p = jnp.pad(x, ((0, 0), (0, C_pad - C), (0, HW_pad - HW)))
    else:
        x_p = x

    tile_hw = _pick_hw_tile(HW_pad, C_pad)
    n_t = HW_pad // tile_hw
    gamma_s = jnp.asarray(gamma, jnp.float32).reshape(1)

    # ---- pass 1: per-batch channel attention matrix [B, C_pad, C_pad] -------
    attn = pl.pallas_call(
        _make_attention_kernel(C, C_pad),
        out_shape=jax.ShapeDtypeStruct((B, C_pad, C_pad), jnp.float32),
        grid=(B, n_t),
        in_specs=[pl.BlockSpec((1, C_pad, tile_hw), lambda b, t: (b, 0, t))],
        out_specs=pl.BlockSpec((1, C_pad, C_pad), lambda b, t: (b, 0, 0)),
        scratch_shapes=[pltpu.VMEM((C_pad, C_pad), jnp.float32)],
        compiler_params=pltpu.CompilerParams(
            dimension_semantics=("parallel", "arbitrary")),
    )(x_p)

    # ---- pass 2: out = gamma * (attn @ X) + X, streamed over H*W tiles ------
    out = pl.pallas_call(
        _apply_kernel,
        out_shape=jax.ShapeDtypeStruct((B, C_pad, HW_pad), x.dtype),
        grid=(B, n_t),
        in_specs=[pl.BlockSpec(memory_space=pltpu.MemorySpace.SMEM),          # gamma
                  pl.BlockSpec((1, C_pad, C_pad), lambda b, t: (b, 0, 0)),    # attention
                  pl.BlockSpec((1, C_pad, tile_hw), lambda b, t: (b, 0, t))], # x tile
        out_specs=pl.BlockSpec((1, C_pad, tile_hw), lambda b, t: (b, 0, t)),
        compiler_params=pltpu.CompilerParams(
            dimension_semantics=("parallel", "parallel")),
    )(gamma_s, attn, x_p)

    if C_pad != C or HW_pad != HW:
        out = out[:, :C, :HW]
    return out.reshape(B, C, H, W)


# --------------------------------------------------------------------------- #
# Pure-JAX reference with identical semantics
# --------------------------------------------------------------------------- #
def reference(x, gamma):
    B, C, H, W = x.shape
    xv = x.reshape(B, C, H * W).astype(jnp.float32)
    energy = jnp.einsum('bcn,bdn->bcd', xv, xv, precision=lax.Precision.HIGHEST)
    e_new = jnp.max(energy, axis=-1, keepdims=True) - energy
    attn = jax.nn.softmax(e_new, axis=-1)
    out = jnp.einsum('bcd,bdn->bcn', attn, xv, precision=lax.Precision.HIGHEST)
    return (gamma * out + xv).reshape(B, C, H, W).astype(x.dtype)


# --------------------------------------------------------------------------- #
if __name__ == "__main__":
    key = jax.random.PRNGKey(0)
    B, C, H, W = 2, 4, 16, 16

    # Scale so Gram-matrix entries are O(1) -> non-trivial softmax weights.
    x = jax.random.normal(key, (B, C, H, W), jnp.float32) * (1.0 / 16.0)

    # PyTorch initializes gamma = 0 (identity residual); use a nonzero value so
    # the attention path is actually exercised, then also check the init case.
    gamma = jnp.float32(0.5)

    out = jax.block_until_ready(cam_module(x, gamma))
    ref = jax.block_until_ready(reference(x, gamma))
    assert out.shape == (B, C, H, W), out.shape
    np.testing.assert_allclose(np.asarray(out), np.asarray(ref), rtol=2e-2, atol=2e-2)

    out0 = jax.block_until_ready(cam_module(x, jnp.float32(0.0)))
    np.testing.assert_allclose(np.asarray(out0), np.asarray(x), rtol=1e-5, atol=1e-5)

    print("KERNEL_OK")
</pallas_src>

<mosaic_0001>
module attributes {stable_mosaic.version = 11 : i64} {
  func.func @kernel(%arg0: i32, %arg1: i32, %arg2: memref<1x8x256xf32, #tpu.memory_space<vmem>>, %arg3: memref<1x8x8xf32, #tpu.memory_space<vmem>>, %arg4: memref<8x8xf32, #tpu.memory_space<vmem>>) attributes {dimension_semantics = [#tpu.dimension_semantics<parallel>, #tpu.dimension_semantics<arbitrary>], iteration_bounds = array<i64: 2, 1>, scalar_prefetch = 0 : i64, scratch_operands = 1 : i64, tpu.core_type = #tpu.core_type<tc>, window_params = [{transform_indices = @transform_0, window_bounds = array<i64: 1, 8, 256>}, {transform_indices = @transform_1, window_bounds = array<i64: 1, 8, 8>}]} {
    %c0_i32 = arith.constant 0 : i32
    %0 = arith.cmpi eq, %arg1, %c0_i32 : i32
    %1 = arith.extui %0 : i1 to i32
    %c0_i32_0 = arith.constant 0 : i32
    %2 = arith.cmpi ne, %1, %c0_i32_0 : i32
    scf.if %2 {
      %cst_9 = arith.constant 0.000000e+00 : f32
      %12 = vector.broadcast %cst_9 : f32 to vector<8x8xf32>
      %c0_10 = arith.constant 0 : index
      %c0_11 = arith.constant 0 : index
      %13 = vector.load %arg4[%c0_10, %c0_11] : memref<8x8xf32, #tpu.memory_space<vmem>>, vector<8x8xf32>
      tpu.vector_store %arg4[%c0_10, %c0_11], %12 {strides = array<i32>} : memref<8x8xf32, #tpu.memory_space<vmem>>, vector<8x8xf32>,
    } else {
    }
    %c0 = arith.constant 0 : index
    %c0_1 = arith.constant 0 : index
    %c0_2 = arith.constant 0 : index
    %3 = vector.load %arg2[%c0, %c0_1, %c0_2] : memref<1x8x256xf32, #tpu.memory_space<vmem>>, vector<1x8x256xf32>
    %4 = vector.shape_cast %3 : vector<1x8x256xf32> to vector<8x256xf32>
    %c0_3 = arith.constant 0 : index
    %c0_4 = arith.constant 0 : index
    %5 = vector.load %arg4[%c0_3, %c0_4] : memref<8x8xf32, #tpu.memory_space<vmem>>, vector<8x8xf32>
    %cst = arith.constant dense<0.000000e+00> : vector<8x8xf32>
    %6 = tpu.matmul %4, %4, %cst {dimension_numbers = #tpu.dot_dimension_numbers<[1], [1], [0], [0], [0, 0, 1, 0], [], []>} : vector<8x256xf32>, vector<8x256xf32>, vector<8x8xf32> -> vector<8x8xf32>
    %7 = arith.addf %5, %6 : vector<8x8xf32>
    %c0_5 = arith.constant 0 : index
    %c0_6 = arith.constant 0 : index
    %8 = vector.load %arg4[%c0_5, %c0_6] : memref<8x8xf32, #tpu.memory_space<vmem>>, vector<8x8xf32>
    tpu.vector_store %arg4[%c0_5, %c0_6], %7 {strides = array<i32>} : memref<8x8xf32, #tpu.memory_space<vmem>>, vector<8x8xf32>,
    %c0_i32_7 = arith.constant 0 : i32
    %9 = arith.cmpi eq, %arg1, %c0_i32_7 : i32
    %10 = arith.extui %9 : i1 to i32
    %c0_i32_8 = arith.constant 0 : i32
    %11 = arith.cmpi ne, %10, %c0_i32_8 : i32
    scf.if %11 {
      %c0_9 = arith.constant 0 : index
      %c0_10 = arith.constant 0 : index
      %12 = vector.load %arg4[%c0_9, %c0_10] : memref<8x8xf32, #tpu.memory_space<vmem>>, vector<8x8xf32>
      %13 = tpu.iota {dimensions = array<i32: 1>} : vector<8x8xi32>
      %c4_i32 = arith.constant 4 : i32
      %14 = vector.broadcast %c4_i32 : i32 to vector<8x8xi32>
      %15 = arith.cmpi slt, %13, %14 : vector<8x8xi32>
      %cst_11 = arith.constant -1.000000e+30 : f32
      %16 = vector.broadcast %cst_11 : f32 to vector<8x8xf32>
      %17 = arith.select %15, %12, %16 : vector<8x8xi1>, vector<8x8xf32>
      %cst_12 = arith.constant dense<0xFF800000> : vector<8xf32>
      %18 = vector.multi_reduction <maximumf>, %17, %cst_12 [1] : vector<8x8xf32> to vector<8xf32>
      %19 = vector.shape_cast %18 : vector<8xf32> to vector<8x1xf32>
      %20 = vector.broadcast %19 : vector<8x1xf32> to vector<8x8xf32>
      %21 = arith.subf %20, %12 : vector<8x8xf32>
      %cst_13 = arith.constant -1.000000e+30 : f32
      %22 = vector.broadcast %cst_13 : f32 to vector<8x8xf32>
      %23 = arith.select %15, %21, %22 : vector<8x8xi1>, vector<8x8xf32>
      %cst_14 = arith.constant dense<0xFF800000> : vector<8xf32>
      %24 = vector.multi_reduction <maximumf>, %23, %cst_14 [1] : vector<8x8xf32> to vector<8xf32>
      %25 = vector.shape_cast %24 : vector<8xf32> to vector<8x1xf32>
      %26 = vector.broadcast %25 : vector<8x1xf32> to vector<8x8xf32>
      %27 = arith.subf %23, %26 : vector<8x8xf32>
      %28 = math.exp %27 : vector<8x8xf32>
      %cst_15 = arith.constant dense<0.000000e+00> : vector<8xf32>
      %29 = vector.multi_reduction <add>, %28, %cst_15 [1] : vector<8x8xf32> to vector<8xf32>
      %30 = vector.shape_cast %29 : vector<8xf32> to vector<8x1xf32>
      %31 = vector.broadcast %30 : vector<8x1xf32> to vector<8x8xf32>
      %32 = arith.divf %28, %31 : vector<8x8xf32>
      %c0_16 = arith.constant 0 : index
      %c0_17 = arith.constant 0 : index
      %c0_18 = arith.constant 0 : index
      %33 = vector.load %arg3[%c0_16, %c0_17, %c0_18] : memref<1x8x8xf32, #tpu.memory_space<vmem>>, vector<1x8x8xf32>
      %34 = vector.shape_cast %33 : vector<1x8x8xf32> to vector<8x8xf32>
      %35 = vector.shape_cast %32 : vector<8x8xf32> to vector<1x8x8xf32>
      tpu.vector_store %arg3[%c0_16, %c0_17, %c0_18], %35 {strides = array<i32>} : memref<1x8x8xf32, #tpu.memory_space<vmem>>, vector<1x8x8xf32>,
    } else {
    }
    return
  }
  func.func @transform_0(%arg0: i32, %arg1: i32) -> (i32, i32, i32) {
    %c0_i32 = arith.constant 0 : i32
    %c0_i32_0 = arith.constant 0 : i32
    return %arg0, %c0_i32, %arg1 : i32, i32, i32
  }
  func.func @transform_1(%arg0: i32, %arg1: i32) -> (i32, i32, i32) {
    %c0_i32 = arith.constant 0 : i32
    %c0_i32_0 = arith.constant 0 : i32
    %c0_i32_1 = arith.constant 0 : i32
    return %arg0, %c0_i32, %c0_i32_0 : i32, i32, i32
  }
}

module attributes {stable_mosaic.version = 11 : i64} {
  func.func @_apply_kernel(%arg0: i32, %arg1: i32, %arg2: memref<1xf32, #tpu.memory_space<smem>>, %arg3: memref<1x8x8xf32, #tpu.memory_space<vmem>>, %arg4: memref<1x8x256xf32, #tpu.memory_space<vmem>>, %arg5: memref<1x8x256xf32, #tpu.memory_space<vmem>>) attributes {dimension_semantics = [#tpu.dimension_semantics<parallel>, #tpu.dimension_semantics<parallel>], iteration_bounds = array<i64: 2, 1>, scalar_prefetch = 0 : i64, scratch_operands = 0 : i64, tpu.core_type = #tpu.core_type<tc>, window_params = [{transform_indices = @transform_0, window_bounds = array<i64: 1>}, {transform_indices = @transform_1, window_bounds = array<i64: 1, 8, 8>}, {transform_indices = @transform_2, window_bounds = array<i64: 1, 8, 256>}, {transform_indices = @transform_3, window_bounds = array<i64: 1, 8, 256>}]} {
    %c0 = arith.constant 0 : index
    %0 = memref.load %arg2[%c0] : memref<1xf32, #tpu.memory_space<smem>>
    %c0_0 = arith.constant 0 : index
    %c0_1 = arith.constant 0 : index
    %c0_2 = arith.constant 0 : index
    %1 = vector.load %arg3[%c0_0, %c0_1, %c0_2] : memref<1x8x8xf32, #tpu.memory_space<vmem>>, vector<1x8x8xf32>
    %2 = vector.shape_cast %1 : vector<1x8x8xf32> to vector<8x8xf32>
    %c0_3 = arith.constant 0 : index
    %c0_4 = arith.constant 0 : index
    %c0_5 = arith.constant 0 : index
    %3 = vector.load %arg4[%c0_3, %c0_4, %c0_5] : memref<1x8x256xf32, #tpu.memory_space<vmem>>, vector<1x8x256xf32>
    %4 = vector.shape_cast %3 : vector<1x8x256xf32> to vector<8x256xf32>
    %cst = arith.constant dense<0.000000e+00> : vector<8x256xf32>
    %5 = tpu.matmul %2, %4, %cst {dimension_numbers = #tpu.dot_dimension_numbers<[1], [0], [0], [1], [0, 0, 1, 1], [], []>} : vector<8x8xf32>, vector<8x256xf32>, vector<8x256xf32> -> vector<8x256xf32>
    %6 = vector.broadcast %0 : f32 to vector<8x256xf32>
    %7 = arith.mulf %6, %5 : vector<8x256xf32>
    %8 = arith.addf %7, %4 : vector<8x256xf32>
    %c0_6 = arith.constant 0 : index
    %c0_7 = arith.constant 0 : index
    %c0_8 = arith.constant 0 : index
    %9 = vector.load %arg5[%c0_6, %c0_7, %c0_8] : memref<1x8x256xf32, #tpu.memory_space<vmem>>, vector<1x8x256xf32>
    %10 = vector.shape_cast %9 : vector<1x8x256xf32> to vector<8x256xf32>
    %11 = vector.shape_cast %8 : vector<8x256xf32> to vector<1x8x256xf32>
    tpu.vector_store %arg5[%c0_6, %c0_7, %c0_8], %11 {strides = array<i32>} : memref<1x8x256xf32, #tpu.memory_space<vmem>>, vector<1x8x256xf32>,
    return
  }
  func.func @transform_0(%arg0: i32, %arg1: i32) -> i32 {
    %c0_i32 = arith.constant 0 : i32
    %c0_i32_0 = arith.constant 0 : i32
    return %c0_i32 : i32
  }
  func.func @transform_1(%arg0: i32, %arg1: i32) -> (i32, i32, i32) {
    %c0_i32 = arith.constant 0 : i32
    %c0_i32_0 = arith.constant 0 : i32
    %c0_i32_1 = arith.constant 0 : i32
    return %arg0, %c0_i32, %c0_i32_0 : i32, i32, i32
  }
  func.func @transform_2(%arg0: i32, %arg1: i32) -> (i32, i32, i32) {
    %c0_i32 = arith.constant 0 : i32
    %c0_i32_0 = arith.constant 0 : i32
    return %arg0, %c0_i32, %arg1 : i32, i32, i32
  }
  func.func @transform_3(%arg0: i32, %arg1: i32) -> (i32, i32, i32) {
    %c0_i32 = arith.constant 0 : i32
    %c0_i32_0 = arith.constant 0 : i32
    return %arg0, %c0_i32, %arg1 : i32, i32, i32
  }
}

</mosaic_0001>

<bundles_post_ra>
// kernel: cam_module.3
= control target key start
LH: loop header
LB: loop body
LE: loop exit
PB: predicated region body
PF: predicated region fallthrough
CT: control target
= control target key end

     0   :  { %s469_s14 = smov 0   ;;  %s471_s15 = smov 0   ;;  %s505_s0 = inlined_call_operand.<no memory space> [shape: f32[1], index: 0, kind: input, shape index: {}]   ;;  %s506_s1 = inlined_call_operand.vmem [shape: f32[2,8,8], index: 1, kind: input, shape index: {}]   ;;  %s507_s2 = inlined_call_operand.vmem [shape: f32[2,8,256], index: 2, kind: input, shape index: {}]   ;;  %s508_s3 = inlined_call_operand.vmem [shape: f32[2,8,256], index: 3, kind: output, shape index: {}]  }
   0x1   :  { %8 = sst [smem:[#allocation2]] %s505_s0  ;;  %s473_s16 = smov 0  }
   0x2 LB: > { %s26_s0 = sadd.s32 1, %s440_s15  ;;  %p386_p0 = scmp.ge.s32.totalorder %s444_s16, 1  ;;  %s444_s16 = sphi %s473_s16, %s14_s16   ;;  %s440_s15 = sphi %s471_s15, %s510_s15   ;;  %s436_s14 = sphi %s469_s14, %s509_s14  }
   0x3   : > { %p28_p1 = scmp.ge.s32.totalorder %s26_s0, 2  ;;  %p168_p2 = scmp.lt.s32.totalorder %s444_s16, 3 }
   0x5   : > { %s512_s0 = smov (%p28_p1, %s26_s0), 0  ;;  %p169_p3 = pnand %p386_p0, %p168_p2 }
   0x6   : > { %p204_p4 = scmp.lt.s32.totalorder (!%p169_p3), %s436_s14, 1  ;;  %s228_s25 = sld [smem:[#allocation2]] (!%p169_p3) }
   0x7   : > { %172 = sbr.rel (%p169_p3) target bundleno = 149 (0x95), region = 32 }
   0xc   : > { %s514_s14 = smov (!%p204_p4, %s436_s14), 1  ;;  %vm232_vm0 = vcmask 64512   ;;  %v276_v3 = vstv %s228_s25 }
   0xd   : > { %s396_s17 = sshll.u32 %s514_s14, 4  ;;  %s387_s18 = sshll.u32 %s514_s14, 3 }
   0xe   : > { %s216_s21 = scalar_lea.vmem %s507_s2, %s396_s17  ;;  %s207_s24 = scalar_lea.vmem %s506_s1, %s387_s18 }
   0xf   : > { %v230_v0 = vld [vmem:[%s216_s21] sm:$0xff]  ;;  %v231_v1 = vld [vmem:[%s216_s21 + $0x8] sm:$0xff]  ;;  %s226_s28 = scalar_lea.vmem %s508_s3, %s396_s17 }
  0x10   : > { %251 = vmatpush.msra.mxu0 %v230_v0  ;;  %271 = vmatpush.msra.mxu1 %v231_v1  ;;  %v229_v2 = vld [vmem:[%s207_s24] sm:$0xff] }
  0x11   : > { %392 = vmatmul.msk.f32.vlgmr.msra.gmra.mxu0 %vm232_vm0, %v229_v2  ;;  %393 = vmatmul.msk.f32.vlgmr.msra.gmra.mxu1 %vm232_vm0, %v229_v2 }
  0x8e   : > { %v253_v4 = vpop.f32.mrf.mxu0  ;;  %v273_v5 = vpop.f32.mrf.mxu1 }
  0x8f   : > { %v277_v6 = vmul.f32 %v276_v3, %v253_v4  ;;  %v278_v7 = vmul.f32 %v276_v3, %v273_v5 }
  0x91   : > { %v279_v8 = vadd.f32 %v277_v6, %v230_v0  ;;  %v280_v9 = vadd.f32 %v278_v7, %v231_v1 }
  0x93   : > { %281 = vst [vmem:[%s226_s28] sm:$0xff] %v279_v8 }
  0x94   : > { %282 = vst [vmem:[%s226_s28 + $0x8] sm:$0xff] %v280_v9 }
  0x95 PF: > { %s14_s16 = sadd.s32 1, %s444_s16   ;;  %s509_s14 = smov %s440_s15 }
  0x96   : > { %p11_p5 = scmp.ge.s32.totalorder %s14_s16, 4   ;;  %s510_s15 = smov %s512_s0 }
  0x98   :  { %13 = sbr.rel (!%p11_p5) target bundleno = 2 (0x2), region = 65 }

// kernel: cam_module.2
= control target key start
LH: loop header
LB: loop body
LE: loop exit
PB: predicated region body
PF: predicated region fallthrough
CT: control target
= control target key end

     0   :  { %s375_s6 = smov 0   ;;  %s377_s7 = smov 0   ;;  %s418_s0 = inlined_call_operand.vmem [shape: f32[2,8,256], index: 0, kind: input, shape index: {}]   ;;  %s419_s1 = inlined_call_operand.vmem [shape: f32[2,8,8], index: 1, kind: output, shape index: {}]  }
   0x1   :  { %s379_s8 = smov 0  }
   0x2 LB: > { %s23_s9 = sadd.s32 1, %s358_s7  ;;  %p304_p0 = scmp.ge.s32.totalorder %s362_s8, 1  ;;  %s362_s8 = sphi %s379_s8, %s11_s8   ;;  %s358_s7 = sphi %s377_s7, %s421_s7   ;;  %s354_s6 = sphi %s375_s6, %s420_s6  }
   0x3   : > { %p25_p1 = scmp.ge.s32.totalorder %s23_s9, 2  ;;  %p106_p2 = scmp.lt.s32.totalorder %s362_s8, 3 }
   0x5   : > { %s423_s9 = smov (%p25_p1, %s23_s9), 0  ;;  %p107_p3 = pnand %p304_p0, %p106_p2 }
   0x6   : > { %p130_p4 = scmp.lt.s32.totalorder (!%p107_p3), %s354_s6, 1 }
   0x7   : > { %110 = sbr.rel (%p107_p3) target bundleno = 543 (0x21f), region = 24 }
   0xc   : > { %s425_s6 = smov (!%p130_p4, %s354_s6), 1  ;;  %vm147_vm0 = vcmask 64512   ;;  %v364_v2 = vmov 0.0   ;;  %v199_v7 = vlaneseq }
   0xd   : > { %s310_s10 = sshll.u32 %s425_s6, 4  ;;  %148 = vst.msk [vmem:[#allocation2] sm:$0xff] %vm147_vm0, %v364_v2  ;;  %s307_s14 = sshll.u32 %s425_s6, 3 }
   0xe   : > { %s137_s13 = scalar_lea.vmem %s418_s0, %s310_s10  ;;  %v200_v9 = vand.u32 127, %v199_v7  ;;  %s142_s17 = scalar_lea.vmem %s419_s1, %s307_s14 }
   0xf   : > { %v149_v0 = vld [vmem:[%s137_s13] sm:$0xff]  ;;  %v150_v1 = vld [vmem:[%s137_s13 + $0x8] sm:$0xff] }
  0x10   : > { %167 = vmatpush.xpose.msra.mxu0 %v149_v0  ;;  %187 = vmatpush.xpose.msra.mxu1 %v150_v1  ;;  %vm201_vm1 = vcmp.lt.s32.totalorder %v200_v9, 4 }
  0x13   : > { %168 = vmatmul.f32.vlgmr.msra.gmra.mxu0 %v149_v0  ;;  %188 = vmatmul.f32.vlgmr.msra.gmra.mxu1 %v150_v1 }
  0x14   : > { %v151_v4 = vld [vmem:[#allocation2] sm:$0xff] }
  0x90   : > { %v169_v3 = vpop.f32.mrf.mxu0  ;;  %v189_v5 = vpop.f32.mrf.mxu1 }
  0x91   : > { %v190_v6 = vadd.f32 %v189_v5, %v169_v3 }
  0x93   : > { %v192_v8 = vadd.f32 %v190_v6, %v151_v4 }
  0x95   : > { %194 = vst.msk [vmem:[#allocation2] sm:$0xff] %vm147_vm0, %v192_v8 }
  0x9c   : > { %v198_v10 = vld [vmem:[#allocation2] sm:$0xff] }
  0x9d   : > { %v202_v11 = vsel %vm201_vm1, %v198_v10, -1e+30 }
  0x9e   : > { %v203_v12 = vsel %vm147_vm0, %v202_v11, -inf }
  0x9f   : > { %204 = vmax.xlane.f32.xlu0 %v203_v12 }
 0x112   : > { %v205_v13 = vpop.xlane.xlu0 %204 }
 0x113   : > { %v206_v14 = vsub.f32 %v205_v13, %v198_v10 }
 0x115   : > { %v207_v15 = vsel %vm201_vm1, %v206_v14, -1e+30 }
 0x116   : > { %v208_v16 = vsel %vm147_vm0, %v207_v15, -inf }
 0x117   : > { %209 = vmax.xlane.f32.xlu0 %v208_v16 }
 0x18a   : > { %v210_v17 = vpop.xlane.xlu0 %209 }
 0x18b   : > { %v211_v18 = vsub.f32 %v207_v15, %v210_v17 }
 0x18d   : > { %v212_v19 = vmul.f32 1.442695, %v211_v18 }
 0x18f   : > { %336 = vpow2.f32 %v212_v19 }
 0x195   : > { %v337_v20 = vpop.eup %336 }
 0x196   : > { %v214_v21 = vsel %vm147_vm0, %v337_v20, 0.0 }
 0x197   : > { %215 = vadd.xlane.f32.xlu1 %v214_v21 }
 0x20a   : > { %v216_v22 = vpop.xlane.xlu1 %215 }
 0x20b   : > { %338 = vrcp.f32 %v216_v22  ;;  %v228_v26 = vand.u32 2147483648, %v216_v22  ;;  %v226_v28 = vand.u32 2147483647, %v216_v22  ;;  %vm222_vm3 = vweird.f32 %v216_v22 }
 0x20d   : > { %v229_v30 = vor.u32 1.1754944e-38, %v228_v26  ;;  %vm227_vm5 = vcmp.eq.f32.partialorder %v226_v28, 8.507059e+37 }
 0x211   : > { %v339_v23 = vpop.eup %338 }
 0x212   : > { %v218_v24 = vmul.f32 %v339_v23, %v216_v22  ;;  %vm223_vm2 = vweird.f32 %v339_v23 }
 0x213   : > { %vm224_vm4 = vmor %vm222_vm3, %vm223_vm2 }
 0x214   : > { %v219_v25 = vsub.f32 1.0, %v218_v24 }
 0x216   : > { %v220_v27 = vmul.f32 %v339_v23, %v219_v25 }
 0x218   : > { %v221_v29 = vadd.f32 %v339_v23, %v220_v27 }
 0x21a   : > { %v225_v31 = vsel %vm224_vm4, %v339_v23, %v221_v29 }
 0x21b   : > { %v230_v32 = vsel %vm227_vm5, %v229_v30, %v225_v31 }
 0x21c   : > { %v231_v33 = vmul.f32 %v337_v20, %v230_v32 }
 0x21e   : > { %232 = vst.msk [vmem:[%s142_s17] sm:$0xff] %vm147_vm0, %v231_v33 }
 0x21f PF: > { %s11_s8 = sadd.s32 1, %s362_s8   ;;  %s420_s6 = smov %s358_s7 }
 0x220   : > { %p8_p5 = scmp.ge.s32.totalorder %s11_s8, 4   ;;  %s421_s7 = smov %s423_s9 }
 0x222   :  { %10 = sbr.rel (!%p8_p5) target bundleno = 2 (0x2), region = 62 }

</bundles_post_ra>
